<compile_context>
chip_gen: v6e
topology: v6e:2x2x1
jax: 0.10.0
libtpu: 0.0.40
codegen_flags: <defaults>
</compile_context>

<pallas_src>
import functools

import jax
import jax.numpy as jnp
from jax.experimental import pallas as pl
from jax.experimental.pallas import tpu as pltpu

_EPS = 1e-5          # nn.GroupNorm default eps
_NUM_GROUPS = 2      # fixed by the module: nn.GroupNorm(2, P)


def _expander_kernel(x_ref, prm_ref, out_ref, *, n_real):
    # x_ref:   (tb, Np)     flattened (and possibly padded) spatial per batch row
    # prm_ref: (P, 4)       columns = [lin_w, lin_b, gn_gamma, gn_beta]
    # out_ref: (tb, P, Np)
    x = x_ref[...].astype(jnp.float32)                # (tb, Np)
    prm = prm_ref[...].astype(jnp.float32)            # (P, 4)
    P = prm_ref.shape[0]
    Np = x_ref.shape[1]
    Pg = P // _NUM_GROUPS

    w   = prm[:, 0:1]                                 # (P, 1) lin weight (per channel)
    b   = prm[:, 1:2]                                 # (P, 1) lin bias
    gam = prm[:, 2:3]                                 # (P, 1) GroupNorm weight
    bet = prm[:, 3:4]                                 # (P, 1) GroupNorm bias

    # ---- lin(x.unsqueeze(-1)) + ReLU, built directly in channels-second layout
    res = jnp.maximum(x[:, None, :] * w[None, :, :] + b[None, :, :], 0.0)  # (tb,P,Np)

    padded = (Np != n_real)
    if padded:
        lane = jax.lax.broadcasted_iota(jnp.int32, (1, 1, Np), 2)
        valid = lane < n_real
        res = jnp.where(valid, res, 0.0)              # padding lanes contribute 0

    inv_cnt = 1.0 / float(Pg * n_real)
    ch = jax.lax.broadcasted_iota(jnp.int32, (1, P, 1), 1)
    in_g0 = ch < Pg                                   # (1, P, 1) group-0 channels

    # ---- GroupNorm(2, P): per-sample, per-group mean over (Pg * n_real) elems
    s1 = jnp.sum(res, axis=-1, keepdims=True)                         # (tb,P,1) XLU
    g0_m = jnp.sum(s1[:, :Pg], axis=1, keepdims=True) * inv_cnt       # (tb,1,1)
    g1_m = jnp.sum(s1[:, Pg:], axis=1, keepdims=True) * inv_cnt
    mean = jnp.where(in_g0, g0_m, g1_m)                               # (tb,P,1)

    # ---- centered two-pass variance (numerically robust, matches reference)
    d = res - mean                                                     # (tb,P,Np)
    dsq = d * d
    if padded:
        dsq = jnp.where(valid, dsq, 0.0)
    v1 = jnp.sum(dsq, axis=-1, keepdims=True)                          # (tb,P,1) XLU
    g0_v = jnp.sum(v1[:, :Pg], axis=1, keepdims=True) * inv_cnt
    g1_v = jnp.sum(v1[:, Pg:], axis=1, keepdims=True) * inv_cnt
    var = jnp.where(in_g0, g0_v, g1_v)                                 # (tb,P,1)
    inv_std = jax.lax.rsqrt(var + _EPS)                                # EUP rsqrt

    # ---- folded affine epilogue: (res - mean)*(inv_std*gamma) + beta + x
    a = inv_std * gam[None, :, :]                                      # (tb,P,1)
    out_ref[...] = (d * a + bet[None, :, :] + x[:, None, :]).astype(out_ref.dtype)


def _vmem_budget():
    """(block+temp budget, vmem_limit_bytes) derived from the actual chip."""
    cap = None
    try:
        info = pltpu.get_tpu_info()
        cap = getattr(info, "vmem_capacity_bytes", None)
    except Exception:
        cap = None
    if not cap:
        cap = 64 * 1024 * 1024            # conservative fallback (v7x per-TC size)
    budget = (3 * cap) // 8               # ~37.5%: 48 MiB @128 MiB, 24 MiB @64 MiB
    limit = min(cap - (16 << 20), 112 << 20)
    limit = max(limit, 32 << 20)
    return int(budget), int(limit)


def _pick_tb(B, P, Np, isz_in, isz_out, budget_bytes):
    """Largest batch tile that (a) divides B, (b) is a multiple of 8 (sublane
    alignment), (c) keeps double-buffered blocks + in-kernel f32 temporaries
    under budget, and (d) prefers an EVEN grid length (v7x dual-TC balance),
    then >=2 steps (software pipelining)."""
    # per batch row: 2x(input block) + 2x(output block) at real itemsize,
    # plus ~3x f32 (res, d, dsq) materialized in the kernel.
    row_bytes = 2 * Np * isz_in + 2 * P * Np * isz_out + 3 * P * Np * 4
    cap = max(1, budget_bytes // row_bytes)
    cands = [t for t in range(8, B + 1, 8) if B % t == 0 and t <= cap]
    if not cands:
        divs = [t for t in range(1, B + 1) if B % t == 0 and t <= cap]
        return max(divs) if divs else 1
    even = [t for t in cands if (B // t) % 2 == 0]
    if even:
        return max(even)
    multi = [t for t in cands if B // t >= 2]
    if multi:
        return max(multi)
    return max(cands)


def expander(x, prm, *, tb=None, out_dtype=None):
    """x: (B, F, d); prm: (P, 4) packed [lin_w, lin_b, gn_gamma, gn_beta].
    Returns (B, P, F, d), matching Expander.forward.
    out_dtype=jnp.bfloat16 halves the dominant write traffic on v5e/v6e if the
    consumer tolerates it; default keeps the input dtype (exact semantics)."""
    B, F, d = x.shape
    P = prm.shape[0]
    assert P % _NUM_GROUPS == 0, "GroupNorm(2, P) requires even P"
    N = F * d
    Np = ((N + 127) // 128) * 128            # lane-dense (unmasked vst) output
    x2 = x.reshape(B, N)
    if Np != N:
        x2 = jnp.pad(x2, ((0, 0), (0, Np - N)))
    out_dtype = x.dtype if out_dtype is None else jnp.dtype(out_dtype)

    budget, vmem_limit = _vmem_budget()
    if tb is None:
        tb = _pick_tb(B, P, Np, x2.dtype.itemsize, jnp.dtype(out_dtype).itemsize,
                      budget)
    assert B % tb == 0

    kernel = functools.partial(_expander_kernel, n_real=N)
    out2 = pl.pallas_call(
        kernel,
        out_shape=jax.ShapeDtypeStruct((B, P, Np), out_dtype),
        grid=(B // tb,),
        in_specs=[
            pl.BlockSpec((tb, Np), lambda i: (i, 0)),    # x, batch-tiled
            pl.BlockSpec((P, 4), lambda i: (0, 0)),      # packed params, resident
        ],
        out_specs=pl.BlockSpec((tb, P, Np), lambda i: (i, 0, 0)),
        compiler_params=pltpu.CompilerParams(
            dimension_semantics=("parallel",),
            vmem_limit_bytes=vmem_limit,
        ),
    )(x2, prm)
    if Np != N:
        out2 = out2[:, :, :N]
    return out2.reshape(B, P, F, d)


def init_params(key, P):
    """Pack Expander parameters into a single (P, 4) slab:
       columns = [lin.weight[:, 0], lin.bias, gn.weight, gn.bias]."""
    k1, k2, k3, k4 = jax.random.split(key, 4)
    bound = 1.0                            # nn.Linear(1, P): 1/sqrt(in_features) = 1
    w = jax.random.uniform(k1, (P,), jnp.float32, -bound, bound)
    b = jax.random.uniform(k2, (P,), jnp.float32, -bound, bound)
    # non-trivial affine so the GroupNorm affine path is actually exercised
    gamma = 1.0 + 0.1 * jax.random.normal(k3, (P,), jnp.float32)
    beta = 0.1 * jax.random.normal(k4, (P,), jnp.float32)
    return jnp.stack([w, b, gamma, beta], axis=1)        # (P, 4)


def reference(x, prm, eps=_EPS):
    """Pure-JAX mirror of the PyTorch Expander.forward, for correctness check."""
    w, b, gamma, beta = prm[:, 0], prm[:, 1], prm[:, 2], prm[:, 3]
    B, F, d = x.shape
    P = prm.shape[0]
    res = jnp.maximum(x[..., None] * w + b, 0.0)         # (B, F, d, P)
    res = jnp.transpose(res, (0, 3, 1, 2))               # (B, P, F, d)
    r = res.reshape(B, _NUM_GROUPS, (P // _NUM_GROUPS) * F * d)
    mu = jnp.mean(r, axis=-1, keepdims=True)
    var = jnp.mean((r - mu) ** 2, axis=-1, keepdims=True)
    rn = ((r - mu) / jnp.sqrt(var + eps)).reshape(B, P, F, d)
    rn = rn * gamma[None, :, None, None] + beta[None, :, None, None]
    return x[:, None, :, :] + rn


if __name__ == "__main__":
    B, F, d, P = 16, 8, 16, 8       # batch, rows, cols, expansion channels (N = 128)
    key = jax.random.PRNGKey(0)
    kx, kp = jax.random.split(key)
    x = jax.random.normal(kx, (B, F, d), jnp.float32)
    prm = init_params(kp, P)

    out = expander(x, prm)
    out = jax.block_until_ready(out)

    ref = reference(x, prm)
    assert out.shape == (B, P, F, d)
    assert jnp.allclose(out, ref, atol=1e-4, rtol=1e-4), \
        float(jnp.max(jnp.abs(out - ref)))
    print("KERNEL_OK")
</pallas_src>

<mosaic_0001>
module attributes {stable_mosaic.version = 11 : i64} {
  func.func @_expander_kernel(%arg0: i32, %arg1: memref<8x128xf32, #tpu.memory_space<vmem>>, %arg2: memref<8x4xf32, #tpu.memory_space<vmem>>, %arg3: memref<8x8x128xf32, #tpu.memory_space<vmem>>) attributes {dimension_semantics = [#tpu.dimension_semantics<parallel>], iteration_bounds = array<i64: 2>, scalar_prefetch = 0 : i64, scratch_operands = 0 : i64, tpu.core_type = #tpu.core_type<tc>, window_params = [{transform_indices = @transform_0, window_bounds = array<i64: 8, 128>}, {pipeline_mode = #tpu.pipeline_mode<synchronous>, transform_indices = @transform_1, window_bounds = array<i64: 8, 4>}, {transform_indices = @transform_2, window_bounds = array<i64: 8, 8, 128>}]} {
    %c0 = arith.constant 0 : index
    %c0_0 = arith.constant 0 : index
    %0 = vector.load %arg1[%c0, %c0_0] : memref<8x128xf32, #tpu.memory_space<vmem>>, vector<8x128xf32>
    %c0_1 = arith.constant 0 : index
    %c0_2 = arith.constant 0 : index
    %1 = vector.load %arg2[%c0_1, %c0_2] : memref<8x4xf32, #tpu.memory_space<vmem>>, vector<8x4xf32>
    %2 = vector.extract_strided_slice %1 {offsets = [0, 0], sizes = [8, 1], strides = [1, 1]} : vector<8x4xf32> to vector<8x1xf32>
    %3 = vector.extract_strided_slice %1 {offsets = [0, 1], sizes = [8, 1], strides = [1, 1]} : vector<8x4xf32> to vector<8x1xf32>
    %4 = vector.extract_strided_slice %1 {offsets = [0, 2], sizes = [8, 1], strides = [1, 1]} : vector<8x4xf32> to vector<8x1xf32>
    %5 = vector.extract_strided_slice %1 {offsets = [0, 3], sizes = [8, 1], strides = [1, 1]} : vector<8x4xf32> to vector<8x1xf32>
    %6 = vector.shape_cast %0 : vector<8x128xf32> to vector<8x1x128xf32>
    %7 = vector.shape_cast %2 : vector<8x1xf32> to vector<1x8x1xf32>
    %8 = vector.broadcast %6 : vector<8x1x128xf32> to vector<8x8x128xf32>
    %9 = vector.broadcast %7 : vector<1x8x1xf32> to vector<8x8x128xf32>
    %10 = arith.mulf %8, %9 : vector<8x8x128xf32>
    %11 = vector.shape_cast %3 : vector<8x1xf32> to vector<1x8x1xf32>
    %12 = vector.broadcast %11 : vector<1x8x1xf32> to vector<8x8x128xf32>
    %13 = arith.addf %10, %12 : vector<8x8x128xf32>
    %cst = arith.constant 0.000000e+00 : f32
    %14 = vector.broadcast %cst : f32 to vector<8x8x128xf32>
    %15 = arith.maximumf %13, %14 : vector<8x8x128xf32>
    %16 = tpu.iota {dimensions = array<i32: 1>} : vector<1x8x1xi32>
    %c4_i32 = arith.constant 4 : i32
    %17 = vector.broadcast %c4_i32 : i32 to vector<1x8x1xi32>
    %18 = arith.cmpi slt, %16, %17 : vector<1x8x1xi32>
    %cst_3 = arith.constant dense<0.000000e+00> : vector<8x8xf32>
    %19 = vector.multi_reduction <add>, %15, %cst_3 [2] : vector<8x8x128xf32> to vector<8x8xf32>
    %20 = vector.shape_cast %19 : vector<8x8xf32> to vector<8x8x1xf32>
    %21 = vector.extract_strided_slice %20 {offsets = [0, 0, 0], sizes = [8, 4, 1], strides = [1, 1, 1]} : vector<8x8x1xf32> to vector<8x4x1xf32>
    %cst_4 = arith.constant dense<0.000000e+00> : vector<8x1xf32>
    %22 = vector.multi_reduction <add>, %21, %cst_4 [1] : vector<8x4x1xf32> to vector<8x1xf32>
    %23 = vector.shape_cast %22 : vector<8x1xf32> to vector<8x1x1xf32>
    %cst_5 = arith.constant 0.001953125 : f32
    %24 = vector.broadcast %cst_5 : f32 to vector<8x1x1xf32>
    %25 = arith.mulf %23, %24 : vector<8x1x1xf32>
    %26 = vector.extract_strided_slice %20 {offsets = [0, 4, 0], sizes = [8, 4, 1], strides = [1, 1, 1]} : vector<8x8x1xf32> to vector<8x4x1xf32>
    %cst_6 = arith.constant dense<0.000000e+00> : vector<8x1xf32>
    %27 = vector.multi_reduction <add>, %26, %cst_6 [1] : vector<8x4x1xf32> to vector<8x1xf32>
    %28 = vector.shape_cast %27 : vector<8x1xf32> to vector<8x1x1xf32>
    %cst_7 = arith.constant 0.001953125 : f32
    %29 = vector.broadcast %cst_7 : f32 to vector<8x1x1xf32>
    %30 = arith.mulf %28, %29 : vector<8x1x1xf32>
    %31 = vector.shape_cast %18 : vector<1x8x1xi1> to vector<1x8x1xi1>
    %32 = vector.broadcast %31 : vector<1x8x1xi1> to vector<8x8x1xi1>
    %33 = vector.shape_cast %25 : vector<8x1x1xf32> to vector<8x1x1xf32>
    %34 = vector.broadcast %33 : vector<8x1x1xf32> to vector<8x8x1xf32>
    %35 = vector.shape_cast %30 : vector<8x1x1xf32> to vector<8x1x1xf32>
    %36 = vector.broadcast %35 : vector<8x1x1xf32> to vector<8x8x1xf32>
    %37 = arith.select %32, %34, %36 : vector<8x8x1xi1>, vector<8x8x1xf32>
    %38 = vector.broadcast %37 : vector<8x8x1xf32> to vector<8x8x128xf32>
    %39 = arith.subf %15, %38 : vector<8x8x128xf32>
    %40 = arith.mulf %39, %39 : vector<8x8x128xf32>
    %cst_8 = arith.constant dense<0.000000e+00> : vector<8x8xf32>
    %41 = vector.multi_reduction <add>, %40, %cst_8 [2] : vector<8x8x128xf32> to vector<8x8xf32>
    %42 = vector.shape_cast %41 : vector<8x8xf32> to vector<8x8x1xf32>
    %43 = vector.extract_strided_slice %42 {offsets = [0, 0, 0], sizes = [8, 4, 1], strides = [1, 1, 1]} : vector<8x8x1xf32> to vector<8x4x1xf32>
    %cst_9 = arith.constant dense<0.000000e+00> : vector<8x1xf32>
    %44 = vector.multi_reduction <add>, %43, %cst_9 [1] : vector<8x4x1xf32> to vector<8x1xf32>
    %45 = vector.shape_cast %44 : vector<8x1xf32> to vector<8x1x1xf32>
    %cst_10 = arith.constant 0.001953125 : f32
    %46 = vector.broadcast %cst_10 : f32 to vector<8x1x1xf32>
    %47 = arith.mulf %45, %46 : vector<8x1x1xf32>
    %48 = vector.extract_strided_slice %42 {offsets = [0, 4, 0], sizes = [8, 4, 1], strides = [1, 1, 1]} : vector<8x8x1xf32> to vector<8x4x1xf32>
    %cst_11 = arith.constant dense<0.000000e+00> : vector<8x1xf32>
    %49 = vector.multi_reduction <add>, %48, %cst_11 [1] : vector<8x4x1xf32> to vector<8x1xf32>
    %50 = vector.shape_cast %49 : vector<8x1xf32> to vector<8x1x1xf32>
    %cst_12 = arith.constant 0.001953125 : f32
    %51 = vector.broadcast %cst_12 : f32 to vector<8x1x1xf32>
    %52 = arith.mulf %50, %51 : vector<8x1x1xf32>
    %53 = vector.shape_cast %18 : vector<1x8x1xi1> to vector<1x8x1xi1>
    %54 = vector.broadcast %53 : vector<1x8x1xi1> to vector<8x8x1xi1>
    %55 = vector.shape_cast %47 : vector<8x1x1xf32> to vector<8x1x1xf32>
    %56 = vector.broadcast %55 : vector<8x1x1xf32> to vector<8x8x1xf32>
    %57 = vector.shape_cast %52 : vector<8x1x1xf32> to vector<8x1x1xf32>
    %58 = vector.broadcast %57 : vector<8x1x1xf32> to vector<8x8x1xf32>
    %59 = arith.select %54, %56, %58 : vector<8x8x1xi1>, vector<8x8x1xf32>
    %cst_13 = arith.constant 9.99999974E-6 : f32
    %60 = vector.broadcast %cst_13 : f32 to vector<8x8x1xf32>
    %61 = arith.addf %59, %60 : vector<8x8x1xf32>
    %62 = math.rsqrt %61 : vector<8x8x1xf32>
    %63 = vector.shape_cast %4 : vector<8x1xf32> to vector<1x8x1xf32>
    %64 = vector.broadcast %63 : vector<1x8x1xf32> to vector<8x8x1xf32>
    %65 = arith.mulf %62, %64 : vector<8x8x1xf32>
    %66 = vector.broadcast %65 : vector<8x8x1xf32> to vector<8x8x128xf32>
    %67 = arith.mulf %39, %66 : vector<8x8x128xf32>
    %68 = vector.shape_cast %5 : vector<8x1xf32> to vector<1x8x1xf32>
    %69 = vector.broadcast %68 : vector<1x8x1xf32> to vector<8x8x128xf32>
    %70 = arith.addf %67, %69 : vector<8x8x128xf32>
    %71 = vector.shape_cast %0 : vector<8x128xf32> to vector<8x1x128xf32>
    %72 = vector.broadcast %71 : vector<8x1x128xf32> to vector<8x8x128xf32>
    %73 = arith.addf %70, %72 : vector<8x8x128xf32>
    %c0_14 = arith.constant 0 : index
    %c0_15 = arith.constant 0 : index
    %c0_16 = arith.constant 0 : index
    %74 = vector.load %arg3[%c0_14, %c0_15, %c0_16] : memref<8x8x128xf32, #tpu.memory_space<vmem>>, vector<8x8x128xf32>
    tpu.vector_store %arg3[%c0_14, %c0_15, %c0_16], %73 {strides = array<i32>} : memref<8x8x128xf32, #tpu.memory_space<vmem>>, vector<8x8x128xf32>,
    return
  }
  func.func @transform_0(%arg0: i32) -> (i32, i32) {
    %c0_i32 = arith.constant 0 : i32
    %c0_i32_0 = arith.constant 0 : i32
    return %arg0, %c0_i32 : i32, i32
  }
  func.func @transform_1(%arg0: i32) -> (i32, i32) {
    %c0_i32 = arith.constant 0 : i32
    %c0_i32_0 = arith.constant 0 : i32
    %c0_i32_1 = arith.constant 0 : i32
    return %c0_i32, %c0_i32_0 : i32, i32
  }
  func.func @transform_2(%arg0: i32) -> (i32, i32, i32) {
    %c0_i32 = arith.constant 0 : i32
    %c0_i32_0 = arith.constant 0 : i32
    %c0_i32_1 = arith.constant 0 : i32
    return %arg0, %c0_i32, %c0_i32_0 : i32, i32, i32
  }
}

</mosaic_0001>

<bundles_post_ra>
// kernel: tpu_custom_call.1
= control target key start
LH: loop header
LB: loop body
LE: loop exit
PB: predicated region body
PF: predicated region fallthrough
CT: control target
= control target key end

     0   :  { %7 = vsyncpa [#allocation3], 0  ;;  %s1426_s0 = inlined_call_operand.hbm [shape: f32[16,128], index: 0, kind: input, shape index: {}]   ;;  %s1427_s1 = inlined_call_operand.vmem [shape: f32[8,4], index: 1, kind: input, shape index: {}]   ;;  %s1428_s2 = inlined_call_operand.hbm [shape: f32[16,8,128], index: 2, kind: output, shape index: {}]  }
   0x1   :  { %9 = vsyncpa [#allocation3 + $0x1], 0 }
   0x2   :  { %10 = vsyncpa [#allocation4], 0 }
   0x3   :  { %12 = vsyncpa [#allocation4 + $0x1], 0  ;;  %s1054_s9 = smov 0   ;;  %s1056_s10 = smov 0  }
   0x4   :  { %s1058_s11 = smov 0   ;;  %s1060_s12 = smov 0  }
   0x5 LB: > { %s1075_s13 = sadd.s32 4294967295, %s1028_s12   ;;  %s846_s14 = sadd.s32 4294967294, %s1028_s12   ;;  %s1028_s12 = sphi %s1060_s12, %s1445_s12   ;;  %s1024_s11 = sphi %s1058_s11, %s1444_s11   ;;  %s1020_s10 = sphi %s1056_s10, %s1443_s10   ;;  %s1016_s9 = sphi %s1054_s9, %s1442_s9  }
   0x6   : > { %s1079_s15 = sadd.s32 1, %s1028_s12   ;;  %s25_s16 = sadd.s32 1, %s1024_s11 }
   0x7   : > { %s22_s17 = ssub.s32 %s1028_s12, %s1079_s15  ;;  %p32_p0 = scmp.ne.s32.totalorder %s1024_s11, %s1020_s10 }
   0x8   : > { %p23_p1 = scmp.eq.s32.totalorder %s22_s17, 0  ;;  %p33_p2 = scmp.eq.s32.totalorder %s1028_s12, 0 }
   0x9   : > { %p38_p3 = scmp.ne.s32.totalorder %s1020_s10, %s1016_s9  ;;  %p39_p4 = scmp.eq.s32.totalorder %s1075_s13, 0 }
   0xa   : > { %s1091_s18 = scalar_select %p23_p1, %s1024_s11, %s25_s16  }
   0xb   : > { %p1093_p5 = por %p33_p2, %p32_p0  ;;  %p1097_p6 = por %p39_p4, %p38_p3 }
   0xc   : > { %p83_p7 = scmp.eq.s32.totalorder %s1075_s13, 1  ;;  %p89_p8 = scmp.eq.s32.totalorder %s846_s14, 1 }
   0xd   : > { %s1432_s20 = scalar_select %p1097_p6, 1, 0 }
   0xe   : > { %p872_p10 = scmp.lt.s32.totalorder %s1028_s12, 2  ;;  %p1104_p11 = por %p83_p7, %p32_p0 }
   0xf   : > { %p1108_p12 = por %p89_p8, %p38_p3  ;;  %s112_s23 = sand.u32 1, %s1024_s11  }
  0x10   : > { %s1433_s21 = scalar_select %p1104_p11, 1, 0 }
  0x11   : > { %s1434_s22 = scalar_select %p1108_p12, 1, 0 }
  0x12   : > { %s850_s24 = sshll.u32 %s1028_s12, 7  ;;  %s849_s25 = sshll.u32 %s112_s23, 3 }
  0x13   : > { %s1117_s28 = scalar_lea.hbm %s1426_s0, %s850_s24  ;;  %s116_s29 = scalar_lea.vmem [#allocation2], %s849_s25 }
  0x14   : > { %s123_s30 = sshll.u32 %s116_s29, 4  ;;  %p1121_p13 = pnand %p872_p10, %p1093_p5  ;;  %s1125_s30 = int_to_ptr.vmem [resolvable:$true] %s123_s30 }
  0x15   : > { %s113_s4 = scalar_lea.sflag [#allocation3], %s112_s23  ;;  %s936_s5 = scalar_lea.hbm %s1117_s28, 128 }
  0x16   : > { %p937_p2 = scmp.ne.s32.totalorder %s1117_s28, %s936_s5  ;;  %p938_p3 = pneg %p1121_p13 }
  0x17   : > { %s941_s8 = scalar_lea.hbm %s1426_s0, 256  ;;  %p942_p5 = scmp.lt.s32.totalorder %s1117_s28, %s1426_s0 }
  0x18   : > { %p939_p4 = pnand %p938_p3, %p937_p2  ;;  %p943_p8 = scmp.lt.s32.totalorder %s941_s8, %s936_s5 }
  0x1a   : > { %p940_p7 = pneg %p939_p4  ;;  %p944_p10 = por %p943_p8, %p942_p5 }
  0x1c   : > { %p945_p9 = pnand %p944_p10, %p940_p7 }
  0x1e   : > { %948 = shalt.err (!%p945_p9)
}
  0x1f   : > { %s949_s17 = scalar_lea.vmem %s1125_s30, 128  ;;  %s1030_s19 = smov [#allocation2]  }
  0x20   : > { %p950_p0 = scmp.ne.s32.totalorder %s1125_s30, %s949_s17  ;;  %s954_s23 = sshll.u32 %s1030_s19, 4  ;;  %s955_s23 = int_to_ptr.vmem [resolvable:$false] %s954_s23 }
  0x21   : > { %s956_s24 = scalar_lea.vmem %s955_s23, 256  ;;  %p957_p4 = scmp.lt.s32.totalorder %s1125_s30, %s955_s23 }
  0x22   : > { %p952_p1 = pnand %p950_p0, %p938_p3  ;;  %p958_p12 = scmp.lt.s32.totalorder %s956_s24, %s949_s17 }
  0x24   : > { %p953_p2 = pneg %p952_p1  ;;  %p959_p11 = por %p958_p12, %p957_p4 }
  0x26   : > { %p960_p6 = pnand %p959_p11, %p953_p2 }
  0x28   : > { %963 = shalt.err (!%p960_p6)
}
  0x29   : > { %867 = dma.hbm_to_vmem [thread:$0]  (!%p1121_p13), %s1117_s28, 128, %s1125_s30, %s113_s4  }
  0x2a   : > { %p1436_p9 = scmp.lt.s32.totalorder %s1028_s12, 3  ;;  %p1437_p7 = scmp.ge.s32.totalorder %s1028_s12, 1 }
  0x2c   : > { %p129_p0 = pnand %p1437_p7, %p1436_p9 }
  0x2d   : > { %s1152_s25 = sand.u32 (!%p129_p0), 1, %s1020_s10   ;;  %p1438_p6 = scmp.ne.s32.totalorder (!%p129_p0), %s1432_s20, 0 }
  0x2e   : > { %132 = sbr.rel (%p129_p0) target bundleno = 716 (0x2cc), region = 28  ;;  %s852_s26 = sshll.u32 (!%p129_p0), %s1152_s25, 3 }
  0x2f   : > { %s135_s27 = scalar_lea.sflag (!%p129_p0), [#allocation3], %s1152_s25  ;;  %s138_s29 = scalar_lea.vmem (!%p129_p0), [#allocation2], %s852_s26 }
  0x33   : > { %1007 = dma.done.wait (%p1438_p6), %s135_s27, 128  }
  0x34   : > { %1009 = vsyncadd (%p1438_p6), %s135_s27, 4294967168  ;;  %v1031_v0 = vmov 0   ;;  %v1163_v1 = vld [vmem:[%s1427_s1] sm:$0xff]  ;;  %v1032_v2 = vmov 1   ;;  %v1033_v3 = vmov 1966171168   ;;  %v167_v5 = vlaneseq }
  0x35   : > { %913 = vset.pattern.permute.xlu0 %v1031_v0  ;;  %v165_v4 = vunpack.c.l.s4 %v1033_v3  ;;  %v160_v9 = vld [vmem:[%s138_s29] sm:$0xff]  ;;  %vm304_vm0 = vcmask 1043456   ;;  %s853_s20 = sshll.u32 %s1152_s25, 6  ;;  %s859_s3 = sshll.u32 %s1075_s13, 10 }
  0x36   : > { %254 = vperm.xlu0 %913, %v1163_v1   ;;  %v1167_v7 = vshrl.u32 %v167_v5, 7  ;;  %v163_v19 = vcombine.high %v160_v9, %v160_v9  ;;  %s158_s4 = scalar_lea.vmem [#allocation5], %s853_s20  ;;  %s1377_s7 = scalar_lea.hbm %s1428_s2, %s859_s3 }
  0x37   : > { %v166_v6 = vunpack.c.0.s8 %v165_v4  ;;  %s773_s5 = sshll.u32 %s158_s4, 4  ;;  %s760_s8 = scalar_lea.sflag [#allocation4], %s1152_s25  ;;  %s1379_s5 = int_to_ptr.vmem [resolvable:$true] %s773_s5 }
  0x38   : > { %v214_v13 = vsub.s32 0, %v1167_v7  ;;  %vm287_vm1 = vcmp.lt.s32.totalorder %v1167_v7, 4  ;;  %s964_s14 = scalar_lea.vmem %s1379_s5, 1024  ;;  %p1439_p12 = scmp.ne.s32.totalorder %s1433_s21, 0 }
  0x39   : > { %v169_v8 = vsub.s32 %v166_v6, %v1167_v7  ;;  %p965_p11 = scmp.ne.s32.totalorder %s1379_s5, %s964_s14  ;;  %s1036_s16 = smov [#allocation5]  }
  0x3a   : > { %914 = vset.pattern.permute.xlu0 %v1032_v2  ;;  %s968_s17 = sshll.u32 %s1036_s16, 4  ;;  %s969_s17 = int_to_ptr.vmem [resolvable:$false] %s968_s17 }
  0x3b   : > { %266 = vperm.xlu0 %914, %v1163_v1   ;;  %v170_v10 = vrot.slane %v160_v9, %v169_v8  ;;  %v177_v24 = vrot.slane %v163_v19, %v169_v8  ;;  %p966_p13 = pnand %p965_p11, %p1439_p12  ;;  %s970_s19 = scalar_lea.vmem %s969_s17, 2048 }
  0x3c   : > { %p971_p3 = scmp.lt.s32.totalorder %s1379_s5, %s969_s17  ;;  %p972_p5 = scmp.lt.s32.totalorder %s970_s19, %s964_s14 }
  0x3d   : > { %v178_v11 = vcombine.high %v170_v10, %v170_v10  ;;  %v186_v15 = vrot.slane %v170_v10, %v169_v8  ;;  %v193_v30 = vrot.slane %v177_v24, %v169_v8  ;;  %v179_v34 = vcombine.high %v177_v24, %v177_v24  ;;  %p967_p1 = pneg %p966_p13 }
  0x3e   : > { %p973_p8 = por %p972_p5, %p971_p3 }
  0x3f   : > { %v200_v12 = vrot.slane %v178_v11, %v169_v8  ;;  %v1171_v17 = vrot.slane %v186_v15, %v214_v13  ;;  %v208_v21 = vcombine.high %v186_v15, %v186_v15  ;;  %v1195_v36 = vrot.slane %v193_v30, %v214_v13 }
  0x40   : > { %v207_v39 = vrot.slane %v179_v34, %v169_v8  ;;  %v209_v42 = vcombine.high %v193_v30, %v193_v30  ;;  %p974_p10 = pnand %p973_p8, %p967_p1 }
  0x41   : > { %v210_v14 = vcombine.high %v200_v12, %v200_v12  ;;  %v1175_v20 = vrot.slane %v200_v12, %v214_v13  ;;  %v1184_v29 = vrot.slane %v208_v21, %v214_v13 }
  0x42   : > { %v1203_v41 = vrot.slane %v207_v39, %v214_v13  ;;  %v1211_v46 = vrot.slane %v209_v42, %v214_v13  ;;  %v211_v47 = vcombine.high %v207_v39, %v207_v39 }
  0x43   : > { %v1173_v18 = vrot.slane %v210_v14, %v214_v13 }
  0x44   : > { %v1219_v51 = vrot.slane %v211_v47, %v214_v13 }
  0xb1   : > { %v255_v16 = vpop.permute.xlu0 %254 }
  0xb2   : > { %v257_v22 = vmul.f32 %v255_v16, %v1171_v17  ;;  %v260_v23 = vmul.f32 %v255_v16, %v1173_v18  ;;  %v258_v28 = vmul.f32 %v255_v16, %v1175_v20  ;;  %v259_v35 = vmul.f32 %v255_v16, %v1184_v29 }
  0xb3   : > { %v261_v40 = vmul.f32 %v255_v16, %v1195_v36  ;;  %v262_v45 = vmul.f32 %v255_v16, %v1203_v41  ;;  %v263_v50 = vmul.f32 %v255_v16, %v1211_v46  ;;  %v264_v54 = vmul.f32 %v255_v16, %v1219_v51 }
  0xb6   : > { %v267_v25 = vpop.permute.xlu0 %266 }
  0xb7   : > { %v1179_v26 = vadd.f32 %v267_v25, %v257_v22  ;;  %v1181_v27 = vadd.f32 %v267_v25, %v260_v23  ;;  %v1188_v33 = vadd.f32 %v267_v25, %v258_v28  ;;  %v1198_v38 = vadd.f32 %v267_v25, %v259_v35 }
  0xb8   : > { %v1206_v44 = vadd.f32 %v267_v25, %v261_v40  ;;  %v1214_v49 = vadd.f32 %v267_v25, %v262_v45  ;;  %v1222_v53 = vadd.f32 %v267_v25, %v263_v50  ;;  %v1228_v56 = vadd.f32 %v267_v25, %v264_v54 }
  0xb9   : > { %v277_v31 = vmax.f32 %v1179_v26, 0.0  ;;  %v280_v32 = vmax.f32 %v1181_v27, 0.0  ;;  %v278_v37 = vmax.f32 %v1188_v33, 0.0  ;;  %v279_v43 = vmax.f32 %v1198_v38, 0.0 }
  0xba   : > { %v281_v48 = vmax.f32 %v1206_v44, 0.0  ;;  %v282_v52 = vmax.f32 %v1214_v49, 0.0  ;;  %v283_v55 = vmax.f32 %v1222_v53, 0.0  ;;  %v284_v57 = vmax.f32 %v1228_v56, 0.0 }
  0xbb   : > { %288 = vadd.xlane.f32.xlu1 %v277_v31  ;;  %294 = vadd.xlane.f32.xlu0 %v280_v32 }
  0xbf   : > { %290 = vadd.xlane.f32.xlu1 %v278_v37 }
  0xc3   : > { %292 = vadd.xlane.f32.xlu1 %v279_v43 }
  0xc7   : > { %296 = vadd.xlane.f32.xlu1 %v281_v48 }
  0xcb   : > { %298 = vadd.xlane.f32.xlu1 %v282_v52 }
  0xcf   : > { %300 = vadd.xlane.f32.xlu1 %v283_v55 }
  0xd3   : > { %302 = vadd.xlane.f32.xlu1 %v284_v57 }
 0x144   : > { %v289_v58 = vpop.xlane.xlu1 %288  ;;  %v295_v59 = vpop.xlane.xlu0 %294 }
 0x145   : > { %v305_v60 = vsel %vm304_vm0, %v289_v58, 0.0  ;;  %v377_v61 = vrot.slane %v289_v58, 4  ;;  %v326_v62 = vsel %vm304_vm0, %v295_v59, 0.0  ;;  %v380_v63 = vrot.slane %v295_v59, 4 }
 0x146   : > { %v306_v0 = vrot.slane %v305_v60, 4  ;;  %v327_v2 = vrot.slane %v326_v62, 4 }
 0x147   : > { %v393_v3 = vsel %vm304_vm0, %v377_v61, 0.0  ;;  %v414_v4 = vsel %vm304_vm0, %v380_v63, 0.0 }
 0x148   : > { %v307_v5 = vadd.f32 %v306_v0, %v305_v60  ;;  %v394_v6 = vrot.slane %v393_v3, 4  ;;  %v328_v8 = vadd.f32 %v327_v2, %v326_v62  ;;  %v415_v9 = vrot.slane %v414_v4, 4  ;;  %v291_v10 = vpop.xlane.xlu1 %290 }
 0x149   : > { %v312_v11 = vsel %vm304_vm0, %v291_v10, 0.0  ;;  %v378_v12 = vrot.slane %v291_v10, 4 }
 0x14a   : > { %v308_v13 = vrot.slane %v307_v5, 2  ;;  %v395_v14 = vadd.f32 %v394_v6, %v393_v3  ;;  %v329_v15 = vrot.slane %v328_v8, 2  ;;  %v416_v16 = vadd.f32 %v415_v9, %v414_v4 }
 0x14b   : > { %v313_v19 = vrot.slane %v312_v11, 4  ;;  %v400_v21 = vsel %vm304_vm0, %v378_v12, 0.0 }
 0x14c   : > { %v309_v22 = vadd.f32 %v308_v13, %v307_v5  ;;  %v396_v23 = vrot.slane %v395_v14, 2  ;;  %v330_v24 = vadd.f32 %v329_v15, %v328_v8  ;;  %v417_v25 = vrot.slane %v416_v16, 2  ;;  %v293_v28 = vpop.xlane.xlu1 %292 }
 0x14d   : > { %v314_v30 = vadd.f32 %v313_v19, %v312_v11  ;;  %v401_v34 = vrot.slane %v400_v21, 4  ;;  %v319_v35 = vsel %vm304_vm0, %v293_v28, 0.0  ;;  %v379_v39 = vrot.slane %v293_v28, 4 }
 0x14e   : > { %v310_v40 = vrot.slane %v309_v22, 1  ;;  %v397_v42 = vadd.f32 %v396_v23, %v395_v14  ;;  %v418_v45 = vadd.f32 %v417_v25, %v416_v16  ;;  %v320_v54 = vrot.slane %v319_v35, 4 }
 0x14f   : > { %v315_v47 = vrot.slane %v314_v30, 2  ;;  %v402_v50 = vadd.f32 %v401_v34, %v400_v21  ;;  %v407_v58 = vsel %vm304_vm0, %v379_v39, 0.0  ;;  %v331_v61 = vrot.slane %v330_v24, 1 }
 0x150   : > { %v311_v59 = vadd.f32 %v310_v40, %v309_v22  ;;  %v398_v60 = vrot.slane %v397_v42, 1  ;;  %v419_v62 = vrot.slane %v418_v45, 1  ;;  %v297_v63 = vpop.xlane.xlu1 %296  ;;  %v321_v3 = vadd.f32 %v320_v54, %v319_v35 }
 0x151   : > { %v316_v0 = vadd.f32 %v315_v47, %v314_v30  ;;  %v403_v2 = vrot.slane %v402_v50, 2  ;;  %v408_v4 = vrot.slane %v407_v58, 4  ;;  %v1244_v12 = vadd.f32 %v331_v61, %v330_v24 }
 0x152   : > { %v399_v5 = vadd.f32 %v398_v60, %v397_v42  ;;  %v322_v9 = vrot.slane %v321_v3, 2  ;;  %v361_v11 = vmul.f32 0.001953125, %v311_v59  ;;  %v333_v13 = vsel %vm304_vm0, %v297_v63, 0.0 }
 0x153   : > { %v317_v6 = vrot.slane %v316_v0, 1  ;;  %v404_v8 = vadd.f32 %v403_v2, %v402_v50  ;;  %v409_v10 = vadd.f32 %v408_v4, %v407_v58  ;;  %v381_v14 = vrot.slane %v297_v63, 4 }
 0x154   : > { %v299_v15 = vpop.xlane.xlu1 %298  ;;  %v420_v16 = vadd.f32 %v419_v62, %v418_v45  ;;  %v323_v21 = vadd.f32 %v322_v9, %v321_v3  ;;  %v334_v23 = vrot.slane %v333_v13, 4  ;;  %v449_v40 = vmul.f32 0.001953125, %v399_v5 }
 0x155   : > { %v405_v19 = vrot.slane %v404_v8, 1  ;;  %v410_v22 = vrot.slane %v409_v10, 2  ;;  %v421_v25 = vsel %vm304_vm0, %v381_v14, 0.0  ;;  %v340_v28 = vsel %vm304_vm0, %v299_v15, 0.0 }
 0x156   : > { %v382_v30 = vrot.slane %v299_v15, 4  ;;  %v318_v34 = vadd.f32 %v317_v6, %v316_v0  ;;  %v324_v35 = vrot.slane %v323_v21, 1  ;;  %v335_v24 = vadd.f32 %v334_v23, %v333_v13 }
 0x157   : > { %v411_v39 = vadd.f32 %v410_v22, %v409_v10  ;;  %v422_v42 = vrot.slane %v421_v25, 4  ;;  %v341_v47 = vrot.slane %v340_v28, 4  ;;  %v406_v45 = vadd.f32 %v405_v19, %v404_v8 }
 0x158   : > { %v428_v50 = vsel %vm304_vm0, %v382_v30, 0.0  ;;  %v301_v54 = vpop.xlane.xlu1 %300  ;;  %v336_v61 = vrot.slane %v335_v24, 2  ;;  %v325_v3 = vadd.f32 %v324_v35, %v323_v21  ;;  %v459_v19 = vsel %vm287_vm1, %v361_v11, %v449_v40 }
 0x159   : > { %v412_v58 = vrot.slane %v411_v39, 1  ;;  %v429_v59 = vrot.slane %v428_v50, 4  ;;  %v347_v60 = vsel %vm304_vm0, %v301_v54, 0.0  ;;  %v423_v62 = vadd.f32 %v422_v42, %v421_v25 }
 0x15a   : > { %v342_v63 = vadd.f32 %v341_v47, %v340_v28  ;;  %v348_v2 = vrot.slane %v347_v60, 4  ;;  %v383_v6 = vrot.slane %v301_v54, 4  ;;  %v337_v5 = vadd.f32 %v336_v61, %v335_v24 }
 0x15b   : > { %v413_v0 = vadd.f32 %v412_v58, %v411_v39  ;;  %v430_v4 = vadd.f32 %v429_v59, %v428_v50  ;;  %v424_v9 = vrot.slane %v423_v62, 2  ;;  %v1257_v39 = vsub.f32 %v277_v31, %v459_v19 }
 0x15c   : > { %v343_v10 = vrot.slane %v342_v63, 2  ;;  %v349_v13 = vadd.f32 %v348_v2, %v347_v60  ;;  %v303_v14 = vpop.xlane.xlu1 %302  ;;  %v435_v8 = vsel %vm304_vm0, %v383_v6, 0.0  ;;  %v338_v23 = vrot.slane %v337_v5, 1 }
 0x15d   : > { %v431_v15 = vrot.slane %v430_v4, 2  ;;  %v354_v22 = vsel %vm304_vm0, %v303_v14, 0.0  ;;  %v425_v25 = vadd.f32 %v424_v9, %v423_v62  ;;  %v436_v35 = vrot.slane %v435_v8, 4 }
 0x15e   : > { %v344_v28 = vadd.f32 %v343_v10, %v342_v63  ;;  %v350_v21 = vrot.slane %v349_v13, 2  ;;  %v355_v24 = vrot.slane %v354_v22, 4  ;;  %v339_v42 = vadd.f32 %v338_v23, %v337_v5 }
 0x15f   : > { %v432_v30 = vadd.f32 %v431_v15, %v430_v4  ;;  %v426_v47 = vrot.slane %v425_v25, 1  ;;  %v437_v59 = vadd.f32 %v436_v35, %v435_v8  ;;  %v475_v11 = vmul.f32 %v1257_v39, %v1257_v39 }
 0x160   : > { %v345_v50 = vrot.slane %v344_v28, 1  ;;  %v351_v54 = vadd.f32 %v350_v21, %v349_v13  ;;  %v356_v40 = vadd.f32 %v355_v24, %v354_v22  ;;  %v362_v60 = vmul.f32 0.001953125, %v318_v34 }
 0x161   : > { %v433_v58 = vrot.slane %v432_v30, 1  ;;  %v363_v61 = vmul.f32 0.001953125, %v325_v3  ;;  %v427_v62 = vadd.f32 %v426_v47, %v425_v25  ;;  %v452_v63 = vmul.f32 0.001953125, %v420_v16  ;;  %483 = vadd.xlane.f32.xlu1 %v475_v11 }
 0x162   : > { %v352_v2 = vrot.slane %v351_v54, 1  ;;  %v438_v4 = vrot.slane %v437_v59, 2  ;;  %v357_v26 = vrot.slane %v356_v40, 2  ;;  %v384_v31 = vrot.slane %v303_v14, 4 }
 0x163   : > { %v365_v6 = vmul.f32 0.001953125, %v339_v42  ;;  %v434_v5 = vadd.f32 %v433_v58, %v432_v30  ;;  %v450_v9 = vmul.f32 0.001953125, %v406_v45  ;;  %v451_v10 = vmul.f32 0.001953125, %v413_v0 }
 0x164   : > { %v346_v13 = vadd.f32 %v345_v50, %v344_v28  ;;  %v439_v15 = vadd.f32 %v438_v4, %v437_v59  ;;  %v442_v8 = vsel %vm304_vm0, %v384_v31, 0.0  ;;  %v453_v19 = vmul.f32 0.001953125, %v427_v62 }
 0x165   : > { %v358_v23 = vadd.f32 %v357_v26, %v356_v40  ;;  %v443_v22 = vrot.slane %v442_v8, 4  ;;  %v460_v34 = vsel %vm287_vm1, %v362_v60, %v450_v9  ;;  %v461_v16 = vsel %vm287_vm1, %v363_v61, %v451_v10 }
 0x166   : > { %v353_v3 = vadd.f32 %v352_v2, %v351_v54  ;;  %v440_v25 = vrot.slane %v439_v15, 1  ;;  %v1268_v14 = vsub.f32 %v278_v37, %v460_v34  ;;  %v1272_v45 = vsub.f32 %v279_v43, %v461_v16 }
 0x167   : > { %v364_v0 = vmul.f32 0.001953125, %v1244_v12  ;;  %v444_v28 = vadd.f32 %v443_v22, %v442_v8  ;;  %v463_v21 = vsel %vm287_vm1, %v365_v6, %v453_v19  ;;  %v454_v30 = vmul.f32 0.001953125, %v434_v5 }
 0x168   : > { %v366_v35 = vmul.f32 0.001953125, %v346_v13  ;;  %v441_v24 = vadd.f32 %v440_v25, %v439_v15  ;;  %v476_v42 = vmul.f32 %v1268_v14, %v1268_v14  ;;  %v359_v47 = vrot.slane %v358_v23, 1 }
 0x169   : > { %v445_v33 = vrot.slane %v444_v28, 2  ;;  %v1281_v37 = vsub.f32 %v281_v48, %v463_v21  ;;  %v462_v38 = vsel %vm287_vm1, %v364_v0, %v452_v63  ;;  %v367_v43 = vmul.f32 0.001953125, %v353_v3 }
 0x16a   : > { %485 = vadd.xlane.f32.xlu1 %v476_v42  ;;  %v477_v12 = vmul.f32 %v1272_v45, %v1272_v45  ;;  %v455_v50 = vmul.f32 0.001953125, %v441_v24  ;;  %v464_v59 = vsel %vm287_vm1, %v366_v35, %v454_v30  ;;  %v1293_v44 = vsub.f32 %v280_v32, %v462_v38 }
 0x16b   : > { %v446_v54 = vadd.f32 %v445_v33, %v444_v28  ;;  %v479_v58 = vmul.f32 %v1281_v37, %v1281_v37  ;;  %v360_v11 = vadd.f32 %v359_v47, %v358_v23  ;;  %v1303_v61 = vsub.f32 %v282_v52, %v464_v59 }
 0x16c   : > { %v465_v48 = vsel %vm287_vm1, %v367_v43, %v455_v50  ;;  %v478_v32 = vmul.f32 %v1293_v44, %v1293_v44  ;;  %v1034_v4 = vmov 2  }
 0x16d   : > { %v447_v40 = vrot.slane %v446_v54, 1  ;;  %491 = vadd.xlane.f32.xlu0 %v479_v58  ;;  %v1299_v60 = vsub.f32 %v283_v55, %v465_v48  ;;  %v368_v63 = vmul.f32 0.001953125, %v360_v11  ;;  %v480_v53 = vmul.f32 %v1303_v61, %v1303_v61  ;;  %916 = vset.pattern.permute.xlu1 %v1034_v4 }
 0x16e   : > { %487 = vadd.xlane.f32.xlu1 %v477_v12  ;;  %915 = vset.pattern.permute.xlu0 %v1034_v4 }
 0x16f   : > { %v448_v62 = vadd.f32 %v447_v40, %v446_v54  ;;  %v481_v27 = vmul.f32 %v1299_v60, %v1299_v60 }
 0x171   : > { %495 = vadd.xlane.f32.xlu0 %v481_v27  ;;  %v456_v2 = vmul.f32 0.001953125, %v448_v62 }
 0x172   : > { %489 = vadd.xlane.f32.xlu1 %v478_v32 }
 0x173   : > { %v466_v55 = vsel %vm287_vm1, %v368_v63, %v456_v2 }
 0x174   : > { %v1315_v49 = vsub.f32 %v284_v57, %v466_v55 }
 0x176   : > { %493 = vadd.xlane.f32.xlu1 %v480_v53  ;;  %v482_v52 = vmul.f32 %v1315_v49, %v1315_v49 }
 0x17a   : > { %497 = vadd.xlane.f32.xlu1 %v482_v52 }
 0x1ea   : > { %v484_v26 = vpop.xlane.xlu1 %483 }
 0x1eb   : > { %v499_v31 = vsel %vm304_vm0, %v484_v26, 0.0  ;;  %v571_v6 = vrot.slane %v484_v26, 4 }
 0x1ec   : > { %v500_v5 = vrot.slane %v499_v31, 4 }
 0x1ed   : > { %v587_v9 = vsel %vm304_vm0, %v571_v6, 0.0 }
 0x1ee   : > { %v501_v10 = vadd.f32 %v500_v5, %v499_v31  ;;  %v588_v13 = vrot.slane %v587_v9, 4 }
 0x1f0   : > { %v502_v56 = vrot.slane %v501_v10, 2  ;;  %v589_v57 = vadd.f32 %v588_v13, %v587_v9 }
 0x1f2   : > { %v503_v15 = vadd.f32 %v502_v56, %v501_v10  ;;  %v590_v8 = vrot.slane %v589_v57, 2 }
 0x1f3   : > { %v486_v19 = vpop.xlane.xlu1 %485 }
 0x1f4   : > { %v506_v23 = vsel %vm304_vm0, %v486_v19, 0.0  ;;  %v572_v22 = vrot.slane %v486_v19, 4  ;;  %v504_v34 = vrot.slane %v503_v15, 1  ;;  %v591_v16 = vadd.f32 %v590_v8, %v589_v57 }
 0x1f5   : > { %v507_v3 = vrot.slane %v506_v23, 4 }
 0x1f6   : > { %v594_v25 = vsel %vm304_vm0, %v572_v22, 0.0  ;;  %v492_v0 = vpop.xlane.xlu0 %491  ;;  %v505_v28 = vadd.f32 %v504_v34, %v503_v15  ;;  %v592_v21 = vrot.slane %v591_v16, 1 }
 0x1f7   : > { %v508_v30 = vadd.f32 %v507_v3, %v506_v23  ;;  %v595_v35 = vrot.slane %v594_v25, 4  ;;  %v488_v24 = vpop.xlane.xlu1 %487  ;;  %v527_v33 = vsel %vm304_vm0, %v492_v0, 0.0  ;;  %v575_v38 = vrot.slane %v492_v0, 4 }
 0x1f8   : > { %v513_v42 = vsel %vm304_vm0, %v488_v24, 0.0  ;;  %v573_v47 = vrot.slane %v488_v24, 4  ;;  %v555_v43 = vmul.f32 0.001953125, %v505_v28  ;;  %v593_v12 = vadd.f32 %v592_v21, %v591_v16 }
 0x1f9   : > { %v509_v50 = vrot.slane %v508_v30, 2  ;;  %v596_v54 = vadd.f32 %v595_v35, %v594_v25  ;;  %v514_v58 = vrot.slane %v513_v42, 4  ;;  %v528_v48 = vrot.slane %v527_v33, 4 }
 0x1fa   : > { %v601_v59 = vsel %vm304_vm0, %v573_v47, 0.0  ;;  %v615_v11 = vsel %vm304_vm0, %v575_v38, 0.0  ;;  %v643_v40 = vmul.f32 0.001953125, %v593_v12 }
 0x1fb   : > { %v510_v62 = vadd.f32 %v509_v50, %v508_v30  ;;  %v597_v27 = vrot.slane %v596_v54, 2  ;;  %v602_v32 = vrot.slane %v601_v59, 4  ;;  %v490_v63 = vpop.xlane.xlu1 %489  ;;  %v515_v2 = vadd.f32 %v514_v58, %v513_v42 }
 0x1fc   : > { %v529_v53 = vadd.f32 %v528_v48, %v527_v33  ;;  %v616_v55 = vrot.slane %v615_v11, 4  ;;  %v520_v52 = vsel %vm304_vm0, %v490_v63, 0.0  ;;  %v651_v4 = vsel %vm287_vm1, %v555_v43, %v643_v40  ;;  %v496_v48 = vpop.xlane.xlu0 %495 }
 0x1fd   : > { %v511_v26 = vrot.slane %v510_v62, 1  ;;  %v598_v31 = vadd.f32 %v597_v27, %v596_v54  ;;  %v603_v6 = vadd.f32 %v602_v32, %v601_v59  ;;  %v659_v5 = vadd.f32 1e-05, %v651_v4 }
 0x1fe   : > { %v516_v9 = vrot.slane %v515_v2, 2  ;;  %v530_v10 = vrot.slane %v529_v53, 2  ;;  %v617_v13 = vadd.f32 %v616_v55, %v615_v11  ;;  %v521_v8 = vrot.slane %v520_v52, 4 }
 0x1ff   : > { %v512_v56 = vadd.f32 %v511_v26, %v510_v62  ;;  %v599_v57 = vrot.slane %v598_v31, 1  ;;  %v604_v15 = vrot.slane %v603_v6, 2  ;;  %920 = vrsqrt.f32 %v659_v5  ;;  %v494_v25 = vpop.xlane.xlu1 %493 }
 0x200   : > { %v517_v19 = vadd.f32 %v516_v9, %v515_v2  ;;  %v531_v23 = vadd.f32 %v530_v10, %v529_v53  ;;  %v618_v22 = vrot.slane %v617_v13, 2  ;;  %v522_v3 = vadd.f32 %v521_v8, %v520_v52 }
 0x201   : > { %v600_v34 = vadd.f32 %v599_v57, %v598_v31  ;;  %v605_v16 = vadd.f32 %v604_v15, %v603_v6  ;;  %v574_v30 = vrot.slane %v490_v63, 4  ;;  %v556_v35 = vmul.f32 0.001953125, %v512_v56 }
 0x202   : > { %v518_v0 = vrot.slane %v517_v19, 1  ;;  %v532_v28 = vrot.slane %v531_v23, 1  ;;  %v619_v21 = vadd.f32 %v618_v22, %v617_v13  ;;  %v523_v47 = vrot.slane %v522_v3, 2 }
 0x203   : > { %v644_v24 = vmul.f32 0.001953125, %v600_v34  ;;  %v606_v42 = vrot.slane %v605_v16, 1  ;;  %v608_v43 = vsel %vm304_vm0, %v574_v30, 0.0  ;;  %v534_v12 = vsel %vm304_vm0, %v494_v25, 0.0  ;;  %v498_v13 = vpop.xlane.xlu1 %497 }
 0x204   : > { %v519_v33 = vadd.f32 %v518_v0, %v517_v19  ;;  %v620_v38 = vrot.slane %v619_v21, 1  ;;  %v524_v58 = vadd.f32 %v523_v47, %v522_v3  ;;  %v609_v59 = vrot.slane %v608_v43, 4 }
 0x205   : > { %v652_v50 = vsel %vm287_vm1, %v556_v35, %v644_v24  ;;  %v607_v54 = vadd.f32 %v606_v42, %v605_v16  ;;  %v533_v62 = vadd.f32 %v532_v28, %v531_v23  ;;  %v535_v53 = vrot.slane %v534_v12, 4 }
 0x206   : > { %v660_v11 = vadd.f32 1e-05, %v652_v50  ;;  %v557_v40 = vmul.f32 0.001953125, %v519_v33  ;;  %v621_v27 = vadd.f32 %v620_v38, %v619_v21  ;;  %v525_v63 = vrot.slane %v524_v58, 1 }
 0x207   : > { %v645_v32 = vmul.f32 0.001953125, %v607_v54  ;;  %v610_v2 = vadd.f32 %v609_v59, %v608_v43  ;;  %v576_v55 = vrot.slane %v494_v25, 4  ;;  %v541_v52 = vsel %vm304_vm0, %v496_v48, 0.0 }
 0x208   : > { %922 = vrsqrt.f32 %v660_v11  ;;  %v647_v26 = vmul.f32 0.001953125, %v621_v27  ;;  %v536_v6 = vadd.f32 %v535_v53, %v534_v12  ;;  %v542_v10 = vrot.slane %v541_v52, 4 }
 0x209   : > { %v653_v4 = vsel %vm287_vm1, %v557_v40, %v645_v32  ;;  %v611_v31 = vrot.slane %v610_v2, 2  ;;  %v622_v9 = vsel %vm304_vm0, %v576_v55, 0.0  ;;  %v559_v56 = vmul.f32 0.001953125, %v533_v62 }
 0x20a   : > { %v661_v5 = vadd.f32 1e-05, %v653_v4  ;;  %v526_v57 = vadd.f32 %v525_v63, %v524_v58  ;;  %v537_v8 = vrot.slane %v536_v6, 2  ;;  %v623_v19 = vrot.slane %v622_v9, 4 }
 0x20b   : > { %v612_v15 = vadd.f32 %v611_v31, %v610_v2  ;;  %v543_v23 = vadd.f32 %v542_v10, %v541_v52  ;;  %v577_v22 = vrot.slane %v496_v48, 4  ;;  %v655_v16 = vsel %vm287_vm1, %v559_v56, %v647_v26 }
 0x20c   : > { %924 = vrsqrt.f32 %v661_v5  ;;  %v921_v34 = vpop.eup %920  ;;  %v538_v25 = vadd.f32 %v537_v8, %v536_v6  ;;  %v548_v0 = vsel %vm304_vm0, %v498_v13, 0.0  ;;  %v624_v28 = vadd.f32 %v623_v19, %v622_v9 }
 0x20d   : > { %v613_v3 = vrot.slane %v612_v15, 1  ;;  %v544_v21 = vrot.slane %v543_v23, 2  ;;  %v629_v30 = vsel %vm304_vm0, %v577_v22, 0.0  ;;  %v549_v35 = vrot.slane %v548_v0, 4 }
 0x20e   : > { %v539_v42 = vrot.slane %v538_v25, 1  ;;  %v630_v47 = vrot.slane %v629_v30, 4  ;;  %v578_v33 = vrot.slane %v498_v13, 4  ;;  %v625_v38 = vrot.slane %v624_v28, 2 }
 0x20f   : > { %v614_v24 = vadd.f32 %v613_v3, %v612_v15  ;;  %v545_v43 = vadd.f32 %v544_v21, %v543_v23  ;;  %v550_v12 = vadd.f32 %v549_v35, %v548_v0  ;;  %v675_v50 = vmul.f32 %v921_v34, %v1163_v1 }
 0x210   : > { %v558_v54 = vmul.f32 0.001953125, %v526_v57  ;;  %v631_v59 = vadd.f32 %v630_v47, %v629_v30  ;;  %v636_v48 = vsel %vm304_vm0, %v578_v33, 0.0  ;;  %v626_v11 = vadd.f32 %v625_v38, %v624_v28 }
 0x211   : > { %v646_v58 = vmul.f32 0.001953125, %v614_v24  ;;  %v546_v40 = vrot.slane %v545_v43, 1  ;;  %v551_v62 = vrot.slane %v550_v12, 2  ;;  %v637_v27 = vrot.slane %v636_v48, 4  ;;  %685 = vperm.xlu0 %915, %v675_v50  }
 0x212   : > { %v663_v32 = vadd.f32 1e-05, %v655_v16  ;;  %v632_v2 = vrot.slane %v631_v59, 2  ;;  %v540_v55 = vadd.f32 %v539_v42, %v538_v25  ;;  %v627_v52 = vrot.slane %v626_v11, 1 }
 0x213   : > { %v654_v63 = vsel %vm287_vm1, %v558_v54, %v646_v58  ;;  %v552_v4 = vadd.f32 %v551_v62, %v550_v12  ;;  %v638_v6 = vadd.f32 %v637_v27, %v636_v48  ;;  %v547_v9 = vadd.f32 %v546_v40, %v545_v43 }
 0x214   : > { %v662_v53 = vadd.f32 1e-05, %v654_v63  ;;  %v633_v31 = vadd.f32 %v632_v2, %v631_v59  ;;  %v628_v5 = vadd.f32 %v627_v52, %v626_v11  ;;  %v1035_v10 = vmov 3  }
 0x215   : > { %v923_v26 = vpop.eup %922  ;;  %918 = vset.pattern.permute.xlu0 %v1035_v10  ;;  %v553_v56 = vrot.slane %v552_v4, 1  ;;  %v639_v57 = vrot.slane %v638_v6, 2  ;;  %v560_v8 = vmul.f32 0.001953125, %v540_v55  ;;  %v561_v3 = vmul.f32 0.001953125, %v547_v9 }
 0x216   : > { %926 = vrsqrt.f32 %v662_v53  ;;  %v634_v13 = vrot.slane %v633_v31, 1  ;;  %v676_v15 = vmul.f32 %v923_v26, %v1163_v1  ;;  %v648_v19 = vmul.f32 0.001953125, %v628_v5 }
 0x217   : > { %928 = vrsqrt.f32 %v663_v32  ;;  %v640_v34 = vadd.f32 %v639_v57, %v638_v6  ;;  %v554_v21 = vadd.f32 %v553_v56, %v552_v4 }
 0x218   : > { %v635_v22 = vadd.f32 %v634_v13, %v633_v31  ;;  %690 = vperm.xlu1 %916, %v676_v15   ;;  %v656_v16 = vsel %vm287_vm1, %v560_v8, %v648_v19 }
 0x219   : > { %v925_v23 = vpop.eup %924  ;;  %v664_v0 = vadd.f32 1e-05, %v656_v16  ;;  %v641_v30 = vrot.slane %v640_v34, 1  ;;  %v562_v47 = vmul.f32 0.001953125, %v554_v21 }
 0x21a   : > { %v677_v25 = vmul.f32 %v925_v23, %v1163_v1  ;;  %v649_v28 = vmul.f32 0.001953125, %v635_v22 }
 0x21b   : > { %930 = vrsqrt.f32 %v664_v0  ;;  %v642_v24 = vadd.f32 %v641_v30, %v640_v34 }
 0x21c   : > { %v657_v35 = vsel %vm287_vm1, %v561_v3, %v649_v28  ;;  %695 = vperm.xlu1 %916, %v677_v25  }
 0x21d   : > { %v665_v42 = vadd.f32 1e-05, %v657_v35  ;;  %v650_v33 = vmul.f32 0.001953125, %v642_v24 }
 0x21f   : > { %932 = vrsqrt.f32 %v665_v42  ;;  %v658_v38 = vsel %vm287_vm1, %v562_v47, %v650_v33 }
 0x220   : > { %v666_v43 = vadd.f32 1e-05, %v658_v38 }
 0x222   : > { %934 = vrsqrt.f32 %v666_v43 }
 0x223   : > { %v927_v12 = vpop.eup %926 }
 0x224   : > { %v678_v50 = vmul.f32 %v927_v12, %v1163_v1  ;;  %v929_v54 = vpop.eup %928 }
 0x225   : > { %v679_v58 = vmul.f32 %v929_v54, %v1163_v1 }
 0x226   : > { %700 = vperm.xlu1 %916, %v678_v50  }
 0x228   : > { %v931_v59 = vpop.eup %930 }
 0x229   : > { %v680_v48 = vmul.f32 %v931_v59, %v1163_v1 }
 0x22a   : > { %705 = vperm.xlu1 %916, %v679_v58  }
 0x22c   : > { %v933_v11 = vpop.eup %932 }
 0x22d   : > { %v681_v40 = vmul.f32 %v933_v11, %v1163_v1 }
 0x22e   : > { %710 = vperm.xlu1 %916, %v680_v48  }
 0x22f   : > { %v935_v7 = vpop.eup %934 }
 0x230   : > { %v682_v62 = vmul.f32 %v935_v7, %v1163_v1 }
 0x232   : > { %715 = vperm.xlu1 %916, %v681_v40  }
 0x236   : > { %720 = vperm.xlu1 %916, %v682_v62  }
 0x23a   : > { %917 = vset.pattern.permute.xlu1 %v1035_v10 }
 0x23b   : > { %732 = vperm.xlu1 %917, %v1163_v1  }
 0x28c   : > { %v686_v4 = vpop.permute.xlu0 %685 }
 0x28d   : > { %v723_v26 = vmul.f32 %v686_v4, %v1257_v39 }
 0x293   : > { %v691_v27 = vpop.permute.xlu1 %690 }
 0x294   : > { %v724_v31 = vmul.f32 %v691_v27, %v1268_v14 }
 0x297   : > { %v696_v32 = vpop.permute.xlu1 %695 }
 0x298   : > { %v725_v6 = vmul.f32 %v696_v32, %v1272_v45 }
 0x2a1   : > { %v701_v63 = vpop.permute.xlu1 %700 }
 0x2a2   : > { %v726_v5 = vmul.f32 %v701_v63, %v1293_v44 }
 0x2a5   : > { %v706_v2 = vpop.permute.xlu1 %705 }
 0x2a6   : > { %v727_v1 = vmul.f32 %v706_v2, %v1281_v37 }
 0x2a9   : > { %v711_v53 = vpop.permute.xlu1 %710 }
 0x2aa   : > { %v728_v9 = vmul.f32 %v711_v53, %v1303_v61 }
 0x2ad   : > { %v716_v55 = vpop.permute.xlu1 %715 }
 0x2ae   : > { %v729_v10 = vmul.f32 %v716_v55, %v1299_v60 }
 0x2b1   : > { %v721_v52 = vpop.permute.xlu1 %720 }
 0x2b2   : > { %v730_v13 = vmul.f32 %v721_v52, %v1315_v49 }
 0x2b6   : > { %v733_v56 = vpop.permute.xlu1 %732 }
 0x2b7   : > { %v735_v57 = vadd.f32 %v733_v56, %v723_v26  ;;  %v736_v39 = vadd.f32 %v733_v56, %v724_v31  ;;  %v737_v15 = vadd.f32 %v733_v56, %v725_v6  ;;  %v738_v14 = vadd.f32 %v733_v56, %v726_v5 }
 0x2b8   : > { %v739_v8 = vadd.f32 %v733_v56, %v727_v1  ;;  %v740_v45 = vadd.f32 %v733_v56, %v728_v9  ;;  %v741_v19 = vadd.f32 %v733_v56, %v729_v10  ;;  %v742_v44 = vadd.f32 %v733_v56, %v730_v13 }
 0x2b9   : > { %v743_v37 = vadd.f32 %v735_v57, %v1171_v17  ;;  %v744_v61 = vadd.f32 %v736_v39, %v1175_v20  ;;  %v745_v60 = vadd.f32 %v737_v15, %v1184_v29  ;;  %v746_v49 = vadd.f32 %v738_v14, %v1173_v18 }
 0x2ba   : > { %v747_v23 = vadd.f32 %v739_v8, %v1195_v36  ;;  %v748_v17 = vadd.f32 %v740_v45, %v1203_v41  ;;  %v749_v20 = vadd.f32 %v741_v19, %v1211_v46  ;;  %v750_v29 = vadd.f32 %v742_v44, %v1219_v51 }
 0x2bb   : > { %751 = vst [vmem:[%s158_s4] sm:$0xff] %v743_v37  ;;  %752 = vst [vmem:[%s158_s4 + $0x8] sm:$0xff] %v744_v61 }
 0x2bc   : > { %753 = vst [vmem:[%s158_s4 + $0x10] sm:$0xff] %v745_v60  ;;  %754 = vst [vmem:[%s158_s4 + $0x18] sm:$0xff] %v746_v49 }
 0x2bd   : > { %755 = vst [vmem:[%s158_s4 + $0x20] sm:$0xff] %v747_v23  ;;  %756 = vst [vmem:[%s158_s4 + $0x28] sm:$0xff] %v748_v17 }
 0x2be   : > { %757 = vst [vmem:[%s158_s4 + $0x30] sm:$0xff] %v749_v20  ;;  %758 = vst [vmem:[%s158_s4 + $0x38] sm:$0xff] %v750_v29 }
 0x2bf   : > { %977 = shalt.err (!%p974_p10)
}
 0x2c0   : > { %s978_s23 = scalar_lea.hbm %s1377_s7, 1024  ;;  %s982_s27 = scalar_lea.hbm %s1428_s2, 2048 }
 0x2c1   : > { %p979_p2 = scmp.ne.s32.totalorder %s1377_s7, %s978_s23  ;;  %p983_p7 = scmp.lt.s32.totalorder %s1377_s7, %s1428_s2 }
 0x2c2   : > { %p984_p0 = scmp.lt.s32.totalorder %s982_s27, %s978_s23 }
 0x2c3   : > { %p980_p4 = pnand %p979_p2, %p1439_p12 }
 0x2c4   : > { %p985_p6 = por %p984_p0, %p983_p7 }
 0x2c5   : > { %p981_p9 = pneg %p980_p4 }
 0x2c7   : > { %p986_p11 = pnand %p985_p6, %p981_p9 }
 0x2c9   : > { %989 = shalt.err (!%p986_p11)
}
 0x2ca   : > { %s1037_s30 = smov 128   ;;  %s1038_s20 = smov 8  }
 0x2cb   : > { %862 = dma.vmem_to_hbm [thread:$0]  (%p1439_p12), %s1379_s5, 1024, %s1377_s7, %s760_s8, %s1037_s30, %s1037_s30, %s1038_s20  }
 0x2cc PF: > { %s788_s3 = sand.u32 1, %s1016_s9   ;;  %p1440_p13 = scmp.ne.s32.totalorder %s1434_s22, 0 }
 0x2cd   : > { %p1441_p1 = scmp.ge.s32.totalorder %s1028_s12, 2  ;;  %s789_s4 = scalar_lea.sflag [#allocation4], %s788_s3 }
 0x2cf   : > { %p869_p3 = pnand %p1441_p1, %p1440_p13 }
 0x2d1   : > { %p870_p5 = pneg %p869_p3 }
 0x2d3   : > { %1011 = dma.done.wait (%p870_p5), %s789_s4, 1024  }
 0x2d4   : > { %1013 = vsyncadd (%p870_p5), %s789_s4, 4294966272  ;;  %p15_p8 = scmp.ge.s32.totalorder %s1079_s15, 4   ;;  %s1442_s9 = smov %s1020_s10 }
 0x2d5   : > { %s1443_s10 = smov %s1024_s11  ;;  %s1444_s11 = smov %s1091_s18 }
 0x2d6   : > { %s1445_s12 = smov %s1079_s15  ;;  %17 = sbr.rel (!%p15_p8) target bundleno = 5 (0x5), region = 73 }
 0x2db   :  { %794 = vsyncpa [#allocation3], 1 }
 0x2dc   :  { %796 = vsyncpa [#allocation3 + $0x1], 1 }
 0x2dd   :  { %797 = vsyncpa [#allocation4], 1 }
 0x2de   :  { %799 = vsyncpa [#allocation4 + $0x1], 1 }

</bundles_post_ra>
